<compile_context>
chip_gen: v5e
topology: v5e:2x2
jax: 0.10.0
libtpu: 0.0.40
codegen_flags: <defaults>
</compile_context>

<pallas_src>
import functools

import jax
import jax.numpy as jnp
from jax.experimental import pallas as pl
from jax.experimental.pallas import tpu as pltpu


def _attention_output_kernel(x_ref, res_ref, w_ref, p_ref, o_ref, acc_ref,
                             *, eps: float):
    k = pl.program_id(1)

    @pl.when(k == 0)
    def _():
        acc_ref[...] = jnp.zeros_like(acc_ref)

    # Partial matmul for this K slice: (tile, tk) @ (tk, D) -> f32 (tile, D).
    acc_ref[...] += jnp.dot(x_ref[...], w_ref[...],
                            preferred_element_type=jnp.float32)

    @pl.when(k == pl.num_programs(1) - 1)
    def _():
        d = o_ref.shape[-1]
        p = p_ref[...].astype(jnp.float32)          # packed (3, D): b, gamma, beta
        bias = p[0:1, :]
        gamma = p[1:2, :]
        beta = p[2:3, :]

        # Linear bias + residual add (dropout == identity in eval mode).
        z = acc_ref[...] + bias + res_ref[...].astype(jnp.float32)

        # Post LayerNorm over the feature dim, one-pass stats in f32.
        inv_d = 1.0 / d
        mu = jnp.sum(z, axis=-1, keepdims=True) * inv_d
        ms = jnp.sum(z * z, axis=-1, keepdims=True) * inv_d
        var = jnp.maximum(ms - mu * mu, 0.0)
        zn = (z - mu) * jax.lax.rsqrt(var + eps)
        o_ref[...] = (zn * gamma + beta).astype(o_ref.dtype)


def _round_up(x: int, m: int) -> int:
    return ((x + m - 1) // m) * m


def attention_output(context: jax.Array,
                     input_tensor: jax.Array,
                     w_o: jax.Array,        # [d_model, d_model], PyTorch (out, in)
                     b_o: jax.Array,        # [d_model]
                     ln_gamma: jax.Array,   # [d_model]
                     ln_beta: jax.Array,    # [d_model]
                     *,
                     eps: float = 1e-12,
                     row_tile: int = 512) -> jax.Array:
    """AttentionOutput forward: Linear -> (dropout=id) -> Add -> LayerNorm(post)."""
    B, S, D = context.shape
    R = B * S
    x_dt = context.dtype
    itemsize = jnp.dtype(x_dt).itemsize
    w_itemsize = jnp.dtype(w_o.dtype).itemsize
    sub = {4: 8, 2: 16, 1: 32}.get(itemsize, 8)     # sublane packing granularity

    # ---- Generation-aware VMEM budget (v7x: 64 MiB physical; v5e/v6e: 128). --
    try:
        phys_vmem = int(pltpu.get_tpu_info().vmem_capacity_bytes)
    except Exception:
        phys_vmem = 64 * 1024 * 1024                # conservative fallback
    cap = max(16 * 1024 * 1024, (phys_vmem * 3) // 4)

    # ---- K tile: largest divisor of D that is a multiple of 128 whose double-
    # buffered weight slab fits in ~half the budget; otherwise tk = D. ---------
    def weight_bytes(t):
        return 2 * t * D * w_itemsize
    tk = D
    if D % 128 == 0:
        for c in [D] + [c for c in (4096, 2048, 1024, 512, 256, 128)
                        if c < D and D % c == 0]:
            tk = c
            if weight_bytes(c) <= cap // 2:
                break

    # ---- Row tile: as large as requested, clamped to the row count, multiple
    # of the sublane granularity, shrunk only if the VMEM footprint demands. ---
    tile = min(row_tile, _round_up(R, sub))
    tile = max(sub, (tile // sub) * sub)

    def footprint(t):
        return (2 * t * tk * itemsize          # context blocks (double-buffered)
                + 2 * t * D * itemsize         # residual blocks
                + 2 * t * D * itemsize         # output blocks
                + weight_bytes(tk)             # weight blocks (double-buffered)
                + 2 * 8 * D * 4                # packed params (sublane padded)
                + t * D * 4                    # f32 accumulator scratch
                + 4 * t * D * 4)               # f32 LN temporaries headroom

    while tile > sub and footprint(tile) > cap:
        tile = max(sub, ((tile // 2) // sub) * sub)

    nk = D // tk
    grid = (pl.cdiv(R, tile), nk)               # ragged last row block is OK
    vmem_limit = int(min(cap, max((footprint(tile) * 5) // 4, 32 * 1024 * 1024)))

    # ---- Operand prep (no padding, no output slice copy). --------------------
    x2 = context.reshape(R, D)
    r2 = input_tensor.reshape(R, D)
    w_t = jnp.transpose(w_o)                    # one-time (in, out) layout
    params = jnp.stack([b_o.astype(jnp.float32),
                        ln_gamma.astype(jnp.float32),
                        ln_beta.astype(jnp.float32)])   # (3, D)

    cost = pl.CostEstimate(
        flops=2 * R * D * D + 10 * R * D,
        transcendentals=R,                       # one rsqrt per row
        bytes_accessed=(3 * R * D * itemsize     # x, residual, out
                        + D * D * w_itemsize     # weight
                        + 3 * D * 4),            # packed params
    )

    x_spec = pl.BlockSpec((tile, tk), lambda i, k: (i, k))
    res_spec = pl.BlockSpec((tile, D), lambda i, k: (i, 0))
    w_spec = pl.BlockSpec((tk, D), lambda i, k: (k, 0))
    p_spec = pl.BlockSpec((3, D), lambda i, k: (0, 0))
    out_spec = pl.BlockSpec((tile, D), lambda i, k: (i, 0))

    out2 = pl.pallas_call(
        functools.partial(_attention_output_kernel, eps=eps),
        out_shape=jax.ShapeDtypeStruct((R, D), x_dt),
        grid_spec=pltpu.PrefetchScalarGridSpec(
            num_scalar_prefetch=0,
            grid=grid,
            in_specs=[x_spec,      # context rows
                      res_spec,    # residual rows
                      w_spec,      # pre-transposed weight slice
                      p_spec],     # packed bias / gamma / beta
            out_specs=out_spec,
            scratch_shapes=[pltpu.VMEM((tile, D), jnp.float32)],
        ),
        compiler_params=pltpu.CompilerParams(
            dimension_semantics=("parallel", "arbitrary"),
            vmem_limit_bytes=vmem_limit),
        cost_estimate=cost,
    )(x2, r2, w_t, params)

    return out2.reshape(B, S, D)


def _reference(context, input_tensor, w_o, b_o, gamma, beta, eps=1e-12):
    y = jnp.einsum("bsd,od->bso", context.astype(jnp.float32),
                   w_o.astype(jnp.float32)) + b_o.astype(jnp.float32)
    z = y + input_tensor.astype(jnp.float32)
    mu = jnp.mean(z, axis=-1, keepdims=True)
    var = jnp.mean((z - mu) ** 2, axis=-1, keepdims=True)
    zn = (z - mu) / jnp.sqrt(var + eps)
    return (zn * gamma + beta).astype(context.dtype)


if __name__ == "__main__":
    # Config: d_model=128 (lane-dense), use_bias=True, dropout (eval -> id),
    # layer_norm_type='post', layer_norm_eps=1e-12.
    B, S, D = 2, 8, 128
    key = jax.random.PRNGKey(0)
    k1, k2, k3, k4, k5, k6 = jax.random.split(key, 6)

    context = jax.random.normal(k1, (B, S, D), dtype=jnp.float32)
    input_tensor = jax.random.normal(k2, (B, S, D), dtype=jnp.float32)

    # Deterministic synthetic parameters (shapes from nn.Linear / LayerNorm).
    w_o = jax.random.normal(k3, (D, D), dtype=jnp.float32) * 0.02   # (out, in)
    b_o = jax.random.normal(k4, (D,), dtype=jnp.float32) * 0.02
    ln_gamma = 1.0 + 0.1 * jax.random.normal(k5, (D,), dtype=jnp.float32)
    ln_beta = 0.1 * jax.random.normal(k6, (D,), dtype=jnp.float32)

    out = attention_output(context, input_tensor, w_o, b_o, ln_gamma, ln_beta)
    out = jax.block_until_ready(out)

    ref = _reference(context, input_tensor, w_o, b_o, ln_gamma, ln_beta)
    assert out.shape == (B, S, D)
    assert jnp.allclose(out, ref, atol=1e-4, rtol=1e-4), "mismatch vs reference"

    print("KERNEL_OK")
</pallas_src>

<mosaic_0001>
module attributes {stable_mosaic.version = 11 : i64} {
  func.func @_attention_output_kernel(%arg0: i32, %arg1: i32, %arg2: memref<16x128xf32, #tpu.memory_space<vmem>>, %arg3: memref<16x128xf32, #tpu.memory_space<vmem>>, %arg4: memref<128x128xf32, #tpu.memory_space<vmem>>, %arg5: memref<3x128xf32, #tpu.memory_space<vmem>>, %arg6: memref<16x128xf32, #tpu.memory_space<vmem>>, %arg7: memref<16x128xf32, #tpu.memory_space<vmem>>) attributes {dimension_semantics = [#tpu.dimension_semantics<parallel>, #tpu.dimension_semantics<arbitrary>], iteration_bounds = array<i64: 1, 1>, scalar_prefetch = 0 : i64, scratch_operands = 1 : i64, tpu.core_type = #tpu.core_type<tc>, window_params = [{transform_indices = @transform_0, window_bounds = array<i64: 16, 128>}, {transform_indices = @transform_1, window_bounds = array<i64: 16, 128>}, {transform_indices = @transform_2, window_bounds = array<i64: 128, 128>}, {pipeline_mode = #tpu.pipeline_mode<synchronous>, transform_indices = @transform_3, window_bounds = array<i64: 3, 128>}, {transform_indices = @transform_4, window_bounds = array<i64: 16, 128>}]} {
    %c0_i32 = arith.constant 0 : i32
    %0 = arith.cmpi eq, %arg1, %c0_i32 : i32
    %1 = arith.extui %0 : i1 to i32
    %c0_i32_0 = arith.constant 0 : i32
    %2 = arith.cmpi ne, %1, %c0_i32_0 : i32
    scf.if %2 {
      %cst_10 = arith.constant 0.000000e+00 : f32
      %12 = vector.broadcast %cst_10 : f32 to vector<16x128xf32>
      %c0_11 = arith.constant 0 : index
      %c0_12 = arith.constant 0 : index
      %13 = vector.load %arg7[%c0_11, %c0_12] : memref<16x128xf32, #tpu.memory_space<vmem>>, vector<16x128xf32>
      tpu.vector_store %arg7[%c0_11, %c0_12], %12 {strides = array<i32>} : memref<16x128xf32, #tpu.memory_space<vmem>>, vector<16x128xf32>,
    } else {
    }
    %c0 = arith.constant 0 : index
    %c0_1 = arith.constant 0 : index
    %3 = vector.load %arg7[%c0, %c0_1] : memref<16x128xf32, #tpu.memory_space<vmem>>, vector<16x128xf32>
    %c0_2 = arith.constant 0 : index
    %c0_3 = arith.constant 0 : index
    %4 = vector.load %arg2[%c0_2, %c0_3] : memref<16x128xf32, #tpu.memory_space<vmem>>, vector<16x128xf32>
    %c0_4 = arith.constant 0 : index
    %c0_5 = arith.constant 0 : index
    %5 = vector.load %arg4[%c0_4, %c0_5] : memref<128x128xf32, #tpu.memory_space<vmem>>, vector<128x128xf32>
    %cst = arith.constant dense<0.000000e+00> : vector<16x128xf32>
    %6 = tpu.matmul %4, %5, %cst {dimension_numbers = #tpu.dot_dimension_numbers<[1], [0], [0], [1], [0, 0, 1, 1], [], []>} : vector<16x128xf32>, vector<128x128xf32>, vector<16x128xf32> -> vector<16x128xf32>
    %7 = arith.addf %3, %6 : vector<16x128xf32>
    %c0_6 = arith.constant 0 : index
    %c0_7 = arith.constant 0 : index
    %8 = vector.load %arg7[%c0_6, %c0_7] : memref<16x128xf32, #tpu.memory_space<vmem>>, vector<16x128xf32>
    tpu.vector_store %arg7[%c0_6, %c0_7], %7 {strides = array<i32>} : memref<16x128xf32, #tpu.memory_space<vmem>>, vector<16x128xf32>,
    %c0_i32_8 = arith.constant 0 : i32
    %9 = arith.cmpi eq, %arg1, %c0_i32_8 : i32
    %10 = arith.extui %9 : i1 to i32
    %c0_i32_9 = arith.constant 0 : i32
    %11 = arith.cmpi ne, %10, %c0_i32_9 : i32
    scf.if %11 {
      %c0_10 = arith.constant 0 : index
      %c0_11 = arith.constant 0 : index
      %12 = vector.load %arg5[%c0_10, %c0_11] : memref<3x128xf32, #tpu.memory_space<vmem>>, vector<3x128xf32>
      %13 = vector.extract_strided_slice %12 {offsets = [0, 0], sizes = [1, 128], strides = [1, 1]} : vector<3x128xf32> to vector<1x128xf32>
      %14 = vector.extract_strided_slice %12 {offsets = [1, 0], sizes = [1, 128], strides = [1, 1]} : vector<3x128xf32> to vector<1x128xf32>
      %15 = vector.extract_strided_slice %12 {offsets = [2, 0], sizes = [1, 128], strides = [1, 1]} : vector<3x128xf32> to vector<1x128xf32>
      %c0_12 = arith.constant 0 : index
      %c0_13 = arith.constant 0 : index
      %16 = vector.load %arg7[%c0_12, %c0_13] : memref<16x128xf32, #tpu.memory_space<vmem>>, vector<16x128xf32>
      %17 = vector.broadcast %13 : vector<1x128xf32> to vector<16x128xf32>
      %18 = arith.addf %16, %17 : vector<16x128xf32>
      %c0_14 = arith.constant 0 : index
      %c0_15 = arith.constant 0 : index
      %19 = vector.load %arg3[%c0_14, %c0_15] : memref<16x128xf32, #tpu.memory_space<vmem>>, vector<16x128xf32>
      %20 = arith.addf %18, %19 : vector<16x128xf32>
      %cst_16 = arith.constant dense<0.000000e+00> : vector<16xf32>
      %21 = vector.multi_reduction <add>, %20, %cst_16 [1] : vector<16x128xf32> to vector<16xf32>
      %22 = vector.shape_cast %21 : vector<16xf32> to vector<16x1xf32>
      %cst_17 = arith.constant 7.812500e-03 : f32
      %23 = vector.broadcast %cst_17 : f32 to vector<16x1xf32>
      %24 = arith.mulf %22, %23 : vector<16x1xf32>
      %25 = arith.mulf %20, %20 : vector<16x128xf32>
      %cst_18 = arith.constant dense<0.000000e+00> : vector<16xf32>
      %26 = vector.multi_reduction <add>, %25, %cst_18 [1] : vector<16x128xf32> to vector<16xf32>
      %27 = vector.shape_cast %26 : vector<16xf32> to vector<16x1xf32>
      %cst_19 = arith.constant 7.812500e-03 : f32
      %28 = vector.broadcast %cst_19 : f32 to vector<16x1xf32>
      %29 = arith.mulf %27, %28 : vector<16x1xf32>
      %30 = arith.mulf %24, %24 : vector<16x1xf32>
      %31 = arith.subf %29, %30 : vector<16x1xf32>
      %cst_20 = arith.constant 0.000000e+00 : f32
      %32 = vector.broadcast %cst_20 : f32 to vector<16x1xf32>
      %33 = arith.maximumf %31, %32 : vector<16x1xf32>
      %34 = vector.broadcast %24 : vector<16x1xf32> to vector<16x128xf32>
      %35 = arith.subf %20, %34 : vector<16x128xf32>
      %cst_21 = arith.constant 9.99999996E-13 : f32
      %36 = vector.broadcast %cst_21 : f32 to vector<16x1xf32>
      %37 = arith.addf %33, %36 : vector<16x1xf32>
      %38 = math.rsqrt %37 : vector<16x1xf32>
      %39 = vector.broadcast %38 : vector<16x1xf32> to vector<16x128xf32>
      %40 = arith.mulf %35, %39 : vector<16x128xf32>
      %41 = vector.broadcast %14 : vector<1x128xf32> to vector<16x128xf32>
      %42 = arith.mulf %40, %41 : vector<16x128xf32>
      %43 = vector.broadcast %15 : vector<1x128xf32> to vector<16x128xf32>
      %44 = arith.addf %42, %43 : vector<16x128xf32>
      %c0_22 = arith.constant 0 : index
      %c0_23 = arith.constant 0 : index
      %45 = vector.load %arg6[%c0_22, %c0_23] : memref<16x128xf32, #tpu.memory_space<vmem>>, vector<16x128xf32>
      tpu.vector_store %arg6[%c0_22, %c0_23], %44 {strides = array<i32>} : memref<16x128xf32, #tpu.memory_space<vmem>>, vector<16x128xf32>,
    } else {
    }
    return
  }
  func.func @transform_0(%arg0: i32, %arg1: i32) -> (i32, i32) {
    %c0_i32 = arith.constant 0 : i32
    return %arg0, %arg1 : i32, i32
  }
  func.func @transform_1(%arg0: i32, %arg1: i32) -> (i32, i32) {
    %c0_i32 = arith.constant 0 : i32
    %c0_i32_0 = arith.constant 0 : i32
    return %arg0, %c0_i32 : i32, i32
  }
  func.func @transform_2(%arg0: i32, %arg1: i32) -> (i32, i32) {
    %c0_i32 = arith.constant 0 : i32
    %c0_i32_0 = arith.constant 0 : i32
    return %arg1, %c0_i32 : i32, i32
  }
  func.func @transform_3(%arg0: i32, %arg1: i32) -> (i32, i32) {
    %c0_i32 = arith.constant 0 : i32
    %c0_i32_0 = arith.constant 0 : i32
    %c0_i32_1 = arith.constant 0 : i32
    return %c0_i32, %c0_i32_0 : i32, i32
  }
  func.func @transform_4(%arg0: i32, %arg1: i32) -> (i32, i32) {
    %c0_i32 = arith.constant 0 : i32
    %c0_i32_0 = arith.constant 0 : i32
    return %arg0, %c0_i32 : i32, i32
  }
}

</mosaic_0001>

<bundles_post_ra>
// kernel: tpu_custom_call.1
= control target key start
LH: loop header
LB: loop body
LE: loop exit
PB: predicated region body
PF: predicated region fallthrough
CT: control target
= control target key end

     0   :  { %9 = vsyncpa [#allocation4], 0  ;;  %s439_s0 = inlined_call_operand.hbm [shape: f32[16,128], index: 0, kind: input, shape index: {}]   ;;  %s440_s1 = inlined_call_operand.hbm [shape: f32[16,128], index: 1, kind: input, shape index: {}]   ;;  %s441_s2 = inlined_call_operand.hbm [shape: f32[128,128], index: 2, kind: input, shape index: {}]   ;;  %s442_s3 = inlined_call_operand.hbm [shape: f32[3,128], index: 3, kind: input, shape index: {}]   ;;  %s443_s4 = inlined_call_operand.hbm [shape: f32[16,128], index: 4, kind: output, shape index: {}]  }
   0x1   :  { %10 = vsyncpa [#allocation7], 0 }
   0x2   :  { %11 = vsyncpa [#allocation10], 0 }
   0x3   :  { %12 = vsyncpa [#allocation5], 0  ;;  %s30_s17 = sshll.u32 %s440_s1, 4  ;;  %s375_s18 = smov [#allocation6]   ;;  %s31_s17 = int_to_ptr.hbm [resolvable:$true] %s30_s17 }
   0x4   :  { %s32_s19 = sshll.u32 %s375_s18, 4  ;;  %s17_s22 = sshll.u32 %s439_s0, 4  ;;  %s33_s19 = int_to_ptr.vmem [resolvable:$true] %s32_s19  ;;  %s18_s22 = int_to_ptr.hbm [resolvable:$true] %s17_s22 }
   0x5   :  { %s376_s23 = smov 128   ;;  %s377_s24 = smov 8  }
   0x6   :  { %38 = dma.hbm_to_vmem [thread:$0]  %s31_s17, 256, %s33_s19, [#allocation7], %s376_s23, %s376_s23, %s377_s24  }
   0x7   :  { %s378_s25 = smov [#allocation3]   ;;  %s43_s1 = sshll.u32 %s441_s2, 4  ;;  %s44_s1 = int_to_ptr.hbm [resolvable:$true] %s43_s1 }
   0x8   :  { %s19_s26 = sshll.u32 %s378_s25, 4  ;;  %s57_s30 = sshll.u32 %s442_s3, 4  ;;  %s20_s26 = int_to_ptr.vmem [resolvable:$true] %s19_s26  ;;  %s58_s30 = int_to_ptr.hbm [resolvable:$true] %s57_s30 }
   0x9   :  { %25 = dma.hbm_to_vmem [thread:$0]  %s18_s22, 256, %s20_s26, [#allocation4], %s376_s23, %s376_s23, %s377_s24  }
   0xa   :  { %s379_s5 = smov [#allocation8]   ;;  %s380_s7 = smov [#allocation9]  }
   0xb   :  { %s45_s6 = sshll.u32 %s379_s5, 4  ;;  %s59_s2 = sshll.u32 %s380_s7, 4  ;;  %s46_s6 = int_to_ptr.vmem [resolvable:$true] %s45_s6  ;;  %s60_s2 = int_to_ptr.vmem [resolvable:$true] %s59_s2 }
   0xc   :  { %51 = dma.hbm_to_vmem [thread:$0]  %s44_s1, 2048, %s46_s6, [#allocation7], %s376_s23, %s376_s23, %s377_s24  }
   0xd   :  { %62 = dma.hbm_to_vmem [thread:$0]  %s58_s30, 64, %s60_s2, [#allocation10]  }
   0xe   :  { %367 = dma.done.wait [#allocation4], 256  }
   0xf   :  { %368 = vsyncadd [#allocation4], 4294967040 }
  0x10   :  { %369 = dma.done.wait [#allocation7], 2304  }
  0x11   :  { %370 = vsyncadd [#allocation7], 4294964992 }
  0x12   :  { %371 = dma.done.wait [#allocation10], 64  }
  0x13   :  { %372 = vsyncadd [#allocation10], 4294967232  ;;  %v104_v0 = vld [vmem:[#allocation8 + $0x78] sm:$0xff]  ;;  %v103_v1 = vld [vmem:[#allocation8 + $0x70] sm:$0xff]  ;;  %s381_s3 = smov [#allocation11]   ;;  %s205_s11 = sshll.u32 %s443_s4, 4  ;;  %s206_s11 = int_to_ptr.hbm [resolvable:$true] %s205_s11 }
  0x14   :  { %105 = vmatpush.msra.mxu0 %v104_v0  ;;  %220 = vmatpush.msra.mxu1 %v104_v0  ;;  %v102_v2 = vld [vmem:[#allocation8 + $0x68] sm:$0xff]  ;;  %v101_v3 = vld [vmem:[#allocation8 + $0x60] sm:$0xff]  ;;  %v100_v4 = vld [vmem:[#allocation8 + $0x58] sm:$0xff]  ;;  %s203_s8 = sshll.u32 %s381_s3, 4  ;;  %s204_s8 = int_to_ptr.vmem [resolvable:$true] %s203_s8 }
  0x15   :  { %v99_v5 = vld [vmem:[#allocation8 + $0x50] sm:$0xff]  ;;  %v98_v6 = vld [vmem:[#allocation8 + $0x48] sm:$0xff]  ;;  %v97_v7 = vld [vmem:[#allocation8 + $0x40] sm:$0xff] }
  0x16   :  { %106 = vmatpush.msra.mxu0 %v103_v1  ;;  %221 = vmatpush.msra.mxu1 %v103_v1  ;;  %v96_v8 = vld [vmem:[#allocation8 + $0x38] sm:$0xff]  ;;  %v95_v9 = vld [vmem:[#allocation8 + $0x30] sm:$0xff]  ;;  %v94_v10 = vld [vmem:[#allocation8 + $0x28] sm:$0xff] }
  0x17   :  { %v93_v11 = vld [vmem:[#allocation8 + $0x20] sm:$0xff]  ;;  %v92_v12 = vld [vmem:[#allocation8 + $0x18] sm:$0xff]  ;;  %v91_v13 = vld [vmem:[#allocation8 + $0x10] sm:$0xff] }
  0x18   :  { %107 = vmatpush.msra.mxu0 %v102_v2  ;;  %222 = vmatpush.msra.mxu1 %v102_v2  ;;  %v90_v14 = vld [vmem:[#allocation8 + $0x8] sm:$0xff]  ;;  %v89_v15 = vld [vmem:[#allocation8] sm:$0xff]  ;;  %v141_v21 = vld [vmem:[#allocation6] sm:$0xff] }
  0x19   :  { %v87_v16 = vld [vmem:[#allocation3] sm:$0xff]  ;;  %v88_v17 = vld [vmem:[#allocation3 + $0x8] sm:$0xff]  ;;  %v142_v26 = vld [vmem:[#allocation6 + $0x8] sm:$0xff] }
  0x1a   :  { %108 = vmatpush.msra.mxu0 %v101_v3  ;;  %223 = vmatpush.msra.mxu1 %v101_v3  ;;  %v428_v18 = vld [vmem:[#allocation9] sm:$0x7] }
  0x1b   :  { %v138_v19 = vperm.slane %v428_v18, 0  ;;  %v191_v53 = vperm.slane %v428_v18, 1  ;;  %v194_v57 = vperm.slane %v428_v18, 2 }
  0x1c   :  { %109 = vmatpush.msra.mxu0 %v100_v4  ;;  %224 = vmatpush.msra.mxu1 %v100_v4 }
  0x1e   :  { %110 = vmatpush.msra.mxu0 %v99_v5  ;;  %225 = vmatpush.msra.mxu1 %v99_v5 }
  0x20   :  { %111 = vmatpush.msra.mxu0 %v98_v6  ;;  %226 = vmatpush.msra.mxu1 %v98_v6 }
  0x22   :  { %112 = vmatpush.msra.mxu0 %v97_v7  ;;  %227 = vmatpush.msra.mxu1 %v97_v7 }
  0x24   :  { %113 = vmatpush.msra.mxu0 %v96_v8  ;;  %228 = vmatpush.msra.mxu1 %v96_v8 }
  0x26   :  { %114 = vmatpush.msra.mxu0 %v95_v9  ;;  %229 = vmatpush.msra.mxu1 %v95_v9 }
  0x28   :  { %115 = vmatpush.msra.mxu0 %v94_v10  ;;  %230 = vmatpush.msra.mxu1 %v94_v10 }
  0x2a   :  { %116 = vmatpush.msra.mxu0 %v93_v11  ;;  %231 = vmatpush.msra.mxu1 %v93_v11 }
  0x2c   :  { %117 = vmatpush.msra.mxu0 %v92_v12  ;;  %232 = vmatpush.msra.mxu1 %v92_v12 }
  0x2e   :  { %118 = vmatpush.msra.mxu0 %v91_v13  ;;  %233 = vmatpush.msra.mxu1 %v91_v13 }
  0x30   :  { %119 = vmatpush.msra.mxu0 %v90_v14  ;;  %234 = vmatpush.msra.mxu1 %v90_v14 }
  0x32   :  { %120 = vmatpush.msra.mxu0 %v89_v15  ;;  %235 = vmatpush.msra.mxu1 %v89_v15 }
  0x33   :  { %121 = vmatmul.f32.vlgmr.msra.gmra.mxu0 %v87_v16  ;;  %124 = vmatmul.f32.vlgmr.msra.gmra.mxu1 %v88_v17 }
  0xb0   :  { %v122_v20 = vpop.f32.mrf.mxu0  ;;  %v125_v22 = vpop.f32.mrf.mxu1 }
  0xb1   :  { %v139_v23 = vadd.f32 %v138_v19, %v122_v20  ;;  %v140_v25 = vadd.f32 %v138_v19, %v125_v22 }
  0xb3   :  { %v143_v24 = vadd.f32 %v141_v21, %v139_v23  ;;  %v144_v28 = vadd.f32 %v142_v26, %v140_v25 }
  0xb5   :  { %145 = vadd.xlane.f32.xlu0 %v143_v24  ;;  %v151_v27 = vmul.f32 %v143_v24, %v143_v24  ;;  %v152_v29 = vmul.f32 %v144_v28, %v144_v28 }
  0xb7   :  { %153 = vadd.xlane.f32.xlu1 %v151_v27 }
  0xbd   :  { %147 = vadd.xlane.f32.xlu0 %v144_v28 }
  0xbf   :  { %155 = vadd.xlane.f32.xlu1 %v152_v29 }
 0x128   :  { %v146_v30 = vpop.xlane.xlu0 %145 }
 0x129   :  { %v149_v31 = vmul.f32 0.0078125, %v146_v30 }
 0x12a   :  { %v154_v32 = vpop.xlane.xlu1 %153 }
 0x12b   :  { %v159_v33 = vmul.f32 %v149_v31, %v149_v31  ;;  %v157_v34 = vmul.f32 0.0078125, %v154_v32  ;;  %v165_v54 = vsub.f32 %v143_v24, %v149_v31 }
 0x12d   :  { %v161_v35 = vsub.f32 %v157_v34, %v159_v33 }
 0x12f   :  { %v163_v36 = vmax.f32 %v161_v35, 0.0 }
 0x130   :  { %v148_v37 = vpop.xlane.xlu0 %147 }
 0x131   :  { %v167_v38 = vadd.f32 1e-12, %v163_v36  ;;  %v150_v39 = vmul.f32 0.0078125, %v148_v37 }
 0x132   :  { %v156_v40 = vpop.xlane.xlu1 %155 }
 0x133   :  { %243 = vrsqrt.f32 %v167_v38  ;;  %v160_v41 = vmul.f32 %v150_v39, %v150_v39  ;;  %v158_v42 = vmul.f32 0.0078125, %v156_v40  ;;  %vm175_vm1 = vweird.f32 %v167_v38 }
 0x134   :  { %v166_v1 = vsub.f32 %v144_v28, %v150_v39 }
 0x135   :  { %v162_v43 = vsub.f32 %v158_v42, %v160_v41 }
 0x137   :  { %v164_v44 = vmax.f32 %v162_v43, 0.0 }
 0x139   :  { %v244_v45 = vpop.eup %243  ;;  %v168_v47 = vadd.f32 1e-12, %v164_v44 }
 0x13a   :  { %v170_v46 = vmul.f32 %v244_v45, %v167_v38  ;;  %vm176_vm0 = vweird.f32 %v244_v45 }
 0x13b   :  { %245 = vrsqrt.f32 %v168_v47  ;;  %vm177_vm2 = vmor %vm175_vm1, %vm176_vm0  ;;  %vm185_vm4 = vweird.f32 %v168_v47 }
 0x13c   :  { %v171_v48 = vmul.f32 %v244_v45, %v170_v46 }
 0x13e   :  { %v172_v49 = vmul.f32 0.5, %v171_v48 }
 0x140   :  { %v173_v50 = vsub.f32 1.5, %v172_v49 }
 0x141   :  { %v246_v51 = vpop.eup %245 }
 0x142   :  { %v174_v52 = vmul.f32 %v244_v45, %v173_v50  ;;  %v180_v55 = vmul.f32 %v246_v51, %v168_v47  ;;  %vm186_vm3 = vweird.f32 %v246_v51 }
 0x143   :  { %vm187_vm5 = vmor %vm185_vm4, %vm186_vm3 }
 0x144   :  { %v178_v56 = vsel %vm177_vm2, %v244_v45, %v174_v52  ;;  %v181_v58 = vmul.f32 %v246_v51, %v180_v55 }
 0x145   :  { %v189_v59 = vmul.f32 %v178_v56, %v165_v54 }
 0x146   :  { %v182_v60 = vmul.f32 0.5, %v181_v58 }
 0x147   :  { %v192_v61 = vmul.f32 %v191_v53, %v189_v59 }
 0x148   :  { %v183_v62 = vsub.f32 1.5, %v182_v60 }
 0x149   :  { %v195_v63 = vadd.f32 %v194_v57, %v192_v61 }
 0x14a   :  { %v184_v0 = vmul.f32 %v246_v51, %v183_v62 }
 0x14b   :  { %197 = vst [vmem:[#allocation11] sm:$0xff] %v195_v63 }
 0x14c   :  { %v188_v2 = vsel %vm187_vm5, %v246_v51, %v184_v0 }
 0x14d   :  { %v190_v3 = vmul.f32 %v188_v2, %v166_v1 }
 0x14f   :  { %v193_v4 = vmul.f32 %v191_v53, %v190_v3 }
 0x151   :  { %v196_v5 = vadd.f32 %v194_v57, %v193_v4 }
 0x153   :  { %198 = vst [vmem:[#allocation11 + $0x8] sm:$0xff] %v196_v5 }
 0x154   :  { %211 = dma.vmem_to_hbm [thread:$0]  %s204_s8, 256, %s206_s11, [#allocation5], %s376_s23, %s376_s23, %s377_s24  }
 0x155   :  { %373 = dma.done.wait [#allocation5], 256  }
 0x156   :  { %374 = vsyncadd [#allocation5], 4294967040 }
 0x157   :  { %216 = vsyncpa [#allocation4], 1 }
 0x158   :  { %217 = vsyncpa [#allocation7], 1 }
 0x159   :  { %218 = vsyncpa [#allocation10], 1 }
 0x15a   :  { %219 = vsyncpa [#allocation5], 1 }

</bundles_post_ra>
